<compile_context>
chip_gen: v7x
topology: tpu7x:2x2x1
jax: 0.10.0
libtpu: 0.0.40
codegen_flags: <defaults>
</compile_context>

<pallas_src>
import functools

import jax
import jax.numpy as jnp
from jax.experimental import pallas as pl
from jax.experimental.pallas import tpu as pltpu

N_INPUTS = 35 * 5      # 175
N_HIDDEN = 128
N_OUTPUTS = 1
BN_EPS = 1e-5


def _mlp_kernel(
    x_ref,
    w1_ref, b1_ref,
    w2_ref, b2_ref,
    w3_ref, b3_ref,
    w4_ref, b4_ref,
    wo_ref, bo_ref,
    o_ref,
):
    """Fused 5-layer MLP on one (tb, 175) batch tile.

    Four (matmul + bias + ReLU) stages (BatchNorm already folded into W/b),
    then the final 128->1 layer computed lane-major so the output store is a
    dense (1, tb) row instead of a (tb, 1) column of masked partial stores.
    """
    h = jnp.maximum(
        jnp.dot(x_ref[...], w1_ref[...], preferred_element_type=jnp.float32)
        + b1_ref[...], 0.0)
    h = jnp.maximum(
        jnp.dot(h, w2_ref[...], preferred_element_type=jnp.float32)
        + b2_ref[...], 0.0)
    h = jnp.maximum(
        jnp.dot(h, w3_ref[...], preferred_element_type=jnp.float32)
        + b3_ref[...], 0.0)
    h = jnp.maximum(
        jnp.dot(h, w4_ref[...], preferred_element_type=jnp.float32)
        + b4_ref[...], 0.0)
    # Final layer, lane-major: o[0, r] = sum_k wo_t[0, k] * h[r, k] + bo.
    o = jnp.dot(wo_ref[...], h.T, preferred_element_type=jnp.float32) + bo_ref[...]
    o_ref[...] = o[None]   # (1, tb) -> (1, 1, tb)


def _pick_tile(batch, tb_max):
    """Batch-tile (rows per grid step): a multiple of 128, capped at tb_max,
    and small enough that the grid has >= 4 steps for large batches so both
    v7x TensorCores get work under dimension_semantics=('parallel',)."""
    rup = lambda x, m: -(-x // m) * m
    tb = rup(pl.cdiv(batch, 4), 128)
    tb = min(tb, tb_max, rup(batch, 128))
    return max(tb, 128)


def _resident(a):
    # Constant block index -> Pallas keeps the block resident in VMEM and does
    # not re-issue its DMA on later grid steps.
    return pl.BlockSpec(a.shape, lambda i, _nd=a.ndim: (0,) * _nd)


@functools.partial(jax.jit, static_argnames=("tb_max",))
def regression_network_forward(x, fparams, *, tb_max=1024):
    """x: (B, 175) float32.  fparams: folded (BN-absorbed) parameters."""
    B, K = x.shape
    tb = _pick_tile(B, tb_max)
    nt = pl.cdiv(B, tb)

    args = (
        x.astype(jnp.float32),
        fparams["w1"], fparams["b1"],
        fparams["w2"], fparams["b2"],
        fparams["w3"], fparams["b3"],
        fparams["w4"], fparams["b4"],
        fparams["wo_t"], fparams["bo"],
    )

    in_specs = [pl.BlockSpec((tb, K), lambda i: (i, 0))] + [
        _resident(a) for a in args[1:]
    ]

    out = pl.pallas_call(
        _mlp_kernel,
        out_shape=jax.ShapeDtypeStruct((nt, 1, tb), jnp.float32),
        grid=(nt,),
        in_specs=in_specs,
        out_specs=pl.BlockSpec((1, 1, tb), lambda i: (i, 0, 0)),
        compiler_params=pltpu.CompilerParams(
            dimension_semantics=("parallel",),
        ),
    )(*args)
    # (nt, 1, tb) -> flat rows; drop the padded tail of the last (partial) tile.
    return out.reshape(nt * tb, 1)[:B]


def _linear_init(key, fan_in, fan_out):
    """PyTorch nn.Linear default init: U(-1/sqrt(fan_in), 1/sqrt(fan_in))."""
    kw, kb = jax.random.split(key)
    bound = 1.0 / jnp.sqrt(jnp.float32(fan_in))
    # Weights stored (in, out) so the kernel computes x @ W.
    w = jax.random.uniform(kw, (fan_in, fan_out), jnp.float32, -bound, bound)
    b = jax.random.uniform(kb, (1, fan_out), jnp.float32, -bound, bound)
    return w, b


def make_params(key):
    """Raw (unfolded) parameters, mirroring the PyTorch module's __init__."""
    keys = jax.random.split(key, 5)
    p = {}
    p["w1"], p["b1"] = _linear_init(keys[0], N_INPUTS, N_HIDDEN)
    p["w2"], p["b2"] = _linear_init(keys[1], N_HIDDEN, N_HIDDEN)
    p["w3"], p["b3"] = _linear_init(keys[2], N_HIDDEN, N_HIDDEN)
    p["w4"], p["b4"] = _linear_init(keys[3], N_HIDDEN, N_HIDDEN)
    p["wo"], p["bo"] = _linear_init(keys[4], N_HIDDEN, N_OUTPUTS)
    # BatchNorm1d defaults: gamma=1, beta=0, running_mean=0, running_var=1.
    gamma = jnp.ones((1, N_HIDDEN), jnp.float32)
    beta = jnp.zeros((1, N_HIDDEN), jnp.float32)
    mean = jnp.zeros((1, N_HIDDEN), jnp.float32)
    var = jnp.ones((1, N_HIDDEN), jnp.float32)
    s = gamma / jnp.sqrt(var + BN_EPS)      # eval-mode BN: y = x*s + t
    t = beta - mean * s
    for i in (1, 2, 3, 4):
        p[f"s{i}"] = s
        p[f"t{i}"] = t
    return p


def fold_params(p):
    """Fold each BN (between ReLU_i and Linear_{i+1}) into the next linear:

      (h*s + t) @ W + b  ==  h @ (diag(s) @ W) + (t @ W + b)

    The final weight is stored transposed, (1, 128), for the lane-major output.
    """
    f = {}
    f["w1"], f["b1"] = p["w1"], p["b1"]          # (175,128), (1,128) — no K pad
    for i in (2, 3, 4):
        s, t = p[f"s{i-1}"], p[f"t{i-1}"]
        f[f"w{i}"] = s.T * p[f"w{i}"]            # scale rows of (in, out) weight
        f[f"b{i}"] = p[f"b{i}"] + t @ p[f"w{i}"]
    s, t = p["s4"], p["t4"]
    f["wo_t"] = (s.T * p["wo"]).T                # (1, 128)
    f["bo"] = p["bo"] + t @ p["wo"]              # (1, 1)
    return f


def _reference_forward(x, p):
    """Plain-JAX reference (unfolded), matching the PyTorch module in eval mode."""
    h = x
    for i in (1, 2, 3, 4):
        h = jnp.maximum(h @ p[f"w{i}"] + p[f"b{i}"], 0.0)
        h = h * p[f"s{i}"] + p[f"t{i}"]
    return h @ p["wo"] + p["bo"]


if __name__ == "__main__":
    key = jax.random.PRNGKey(0)
    k_params, k_x = jax.random.split(key)
    params = make_params(k_params)
    fparams = fold_params(params)

    # Deliberately NOT a multiple of the batch tile: exercises the partial
    # tail tile (masked/discarded rows) and a multi-step grid (tb=128 -> 3 steps).
    B = 300
    x = jax.random.normal(k_x, (B, N_INPUTS), jnp.float32)

    out = regression_network_forward(x, fparams)
    out = jax.block_until_ready(out)

    ref = _reference_forward(x, params)
    assert out.shape == (B, N_OUTPUTS), out.shape
    max_err = float(jnp.max(jnp.abs(out - ref)))
    assert jnp.allclose(out, ref, atol=1e-4, rtol=1e-4), max_err
    print("KERNEL_OK")
</pallas_src>

<mosaic_0001>
module attributes {stable_mosaic.version = 11 : i64} {
  func.func @_mlp_kernel(%arg0: i32, %arg1: memref<128x175xf32, #tpu.memory_space<vmem>>, %arg2: memref<175x128xf32, #tpu.memory_space<vmem>>, %arg3: memref<1x128xf32, #tpu.memory_space<vmem>>, %arg4: memref<128x128xf32, #tpu.memory_space<vmem>>, %arg5: memref<1x128xf32, #tpu.memory_space<vmem>>, %arg6: memref<128x128xf32, #tpu.memory_space<vmem>>, %arg7: memref<1x128xf32, #tpu.memory_space<vmem>>, %arg8: memref<128x128xf32, #tpu.memory_space<vmem>>, %arg9: memref<1x128xf32, #tpu.memory_space<vmem>>, %arg10: memref<1x128xf32, #tpu.memory_space<vmem>>, %arg11: memref<1x1xf32, #tpu.memory_space<vmem>>, %arg12: memref<1x1x128xf32, #tpu.memory_space<vmem>>) attributes {dimension_semantics = [#tpu.dimension_semantics<parallel>], iteration_bounds = array<i64: 3>, scalar_prefetch = 0 : i64, scratch_operands = 0 : i64, tpu.core_type = #tpu.core_type<tc>, window_params = [{transform_indices = @transform_0, window_bounds = array<i64: 128, 175>}, {pipeline_mode = #tpu.pipeline_mode<synchronous>, transform_indices = @transform_1, window_bounds = array<i64: 175, 128>}, {pipeline_mode = #tpu.pipeline_mode<synchronous>, transform_indices = @transform_2, window_bounds = array<i64: 1, 128>}, {pipeline_mode = #tpu.pipeline_mode<synchronous>, transform_indices = @transform_3, window_bounds = array<i64: 128, 128>}, {pipeline_mode = #tpu.pipeline_mode<synchronous>, transform_indices = @transform_4, window_bounds = array<i64: 1, 128>}, {pipeline_mode = #tpu.pipeline_mode<synchronous>, transform_indices = @transform_5, window_bounds = array<i64: 128, 128>}, {pipeline_mode = #tpu.pipeline_mode<synchronous>, transform_indices = @transform_6, window_bounds = array<i64: 1, 128>}, {pipeline_mode = #tpu.pipeline_mode<synchronous>, transform_indices = @transform_7, window_bounds = array<i64: 128, 128>}, {pipeline_mode = #tpu.pipeline_mode<synchronous>, transform_indices = @transform_8, window_bounds = array<i64: 1, 128>}, {pipeline_mode = #tpu.pipeline_mode<synchronous>, transform_indices = @transform_9, window_bounds = array<i64: 1, 128>}, {pipeline_mode = #tpu.pipeline_mode<synchronous>, transform_indices = @transform_10, window_bounds = array<i64: 1, 1>}, {transform_indices = @transform_11, window_bounds = array<i64: 1, 1, 128>}]} {
    %c0 = arith.constant 0 : index
    %c0_0 = arith.constant 0 : index
    %0 = vector.load %arg1[%c0, %c0_0] : memref<128x175xf32, #tpu.memory_space<vmem>>, vector<128x175xf32>
    %c0_1 = arith.constant 0 : index
    %c0_2 = arith.constant 0 : index
    %1 = vector.load %arg2[%c0_1, %c0_2] : memref<175x128xf32, #tpu.memory_space<vmem>>, vector<175x128xf32>
    %cst = arith.constant dense<0.000000e+00> : vector<128x128xf32>
    %2 = tpu.matmul %0, %1, %cst {dimension_numbers = #tpu.dot_dimension_numbers<[1], [0], [0], [1], [0, 0, 1, 1], [], []>} : vector<128x175xf32>, vector<175x128xf32>, vector<128x128xf32> -> vector<128x128xf32>
    %c0_3 = arith.constant 0 : index
    %c0_4 = arith.constant 0 : index
    %3 = vector.load %arg3[%c0_3, %c0_4] : memref<1x128xf32, #tpu.memory_space<vmem>>, vector<1x128xf32>
    %4 = vector.broadcast %3 : vector<1x128xf32> to vector<128x128xf32>
    %5 = arith.addf %2, %4 : vector<128x128xf32>
    %cst_5 = arith.constant 0.000000e+00 : f32
    %6 = vector.broadcast %cst_5 : f32 to vector<128x128xf32>
    %7 = arith.maximumf %5, %6 : vector<128x128xf32>
    %c0_6 = arith.constant 0 : index
    %c0_7 = arith.constant 0 : index
    %8 = vector.load %arg4[%c0_6, %c0_7] : memref<128x128xf32, #tpu.memory_space<vmem>>, vector<128x128xf32>
    %cst_8 = arith.constant dense<0.000000e+00> : vector<128x128xf32>
    %9 = tpu.matmul %7, %8, %cst_8 {dimension_numbers = #tpu.dot_dimension_numbers<[1], [0], [0], [1], [0, 0, 1, 1], [], []>} : vector<128x128xf32>, vector<128x128xf32>, vector<128x128xf32> -> vector<128x128xf32>
    %c0_9 = arith.constant 0 : index
    %c0_10 = arith.constant 0 : index
    %10 = vector.load %arg5[%c0_9, %c0_10] : memref<1x128xf32, #tpu.memory_space<vmem>>, vector<1x128xf32>
    %11 = vector.broadcast %10 : vector<1x128xf32> to vector<128x128xf32>
    %12 = arith.addf %9, %11 : vector<128x128xf32>
    %cst_11 = arith.constant 0.000000e+00 : f32
    %13 = vector.broadcast %cst_11 : f32 to vector<128x128xf32>
    %14 = arith.maximumf %12, %13 : vector<128x128xf32>
    %c0_12 = arith.constant 0 : index
    %c0_13 = arith.constant 0 : index
    %15 = vector.load %arg6[%c0_12, %c0_13] : memref<128x128xf32, #tpu.memory_space<vmem>>, vector<128x128xf32>
    %cst_14 = arith.constant dense<0.000000e+00> : vector<128x128xf32>
    %16 = tpu.matmul %14, %15, %cst_14 {dimension_numbers = #tpu.dot_dimension_numbers<[1], [0], [0], [1], [0, 0, 1, 1], [], []>} : vector<128x128xf32>, vector<128x128xf32>, vector<128x128xf32> -> vector<128x128xf32>
    %c0_15 = arith.constant 0 : index
    %c0_16 = arith.constant 0 : index
    %17 = vector.load %arg7[%c0_15, %c0_16] : memref<1x128xf32, #tpu.memory_space<vmem>>, vector<1x128xf32>
    %18 = vector.broadcast %17 : vector<1x128xf32> to vector<128x128xf32>
    %19 = arith.addf %16, %18 : vector<128x128xf32>
    %cst_17 = arith.constant 0.000000e+00 : f32
    %20 = vector.broadcast %cst_17 : f32 to vector<128x128xf32>
    %21 = arith.maximumf %19, %20 : vector<128x128xf32>
    %c0_18 = arith.constant 0 : index
    %c0_19 = arith.constant 0 : index
    %22 = vector.load %arg8[%c0_18, %c0_19] : memref<128x128xf32, #tpu.memory_space<vmem>>, vector<128x128xf32>
    %cst_20 = arith.constant dense<0.000000e+00> : vector<128x128xf32>
    %23 = tpu.matmul %21, %22, %cst_20 {dimension_numbers = #tpu.dot_dimension_numbers<[1], [0], [0], [1], [0, 0, 1, 1], [], []>} : vector<128x128xf32>, vector<128x128xf32>, vector<128x128xf32> -> vector<128x128xf32>
    %c0_21 = arith.constant 0 : index
    %c0_22 = arith.constant 0 : index
    %24 = vector.load %arg9[%c0_21, %c0_22] : memref<1x128xf32, #tpu.memory_space<vmem>>, vector<1x128xf32>
    %25 = vector.broadcast %24 : vector<1x128xf32> to vector<128x128xf32>
    %26 = arith.addf %23, %25 : vector<128x128xf32>
    %cst_23 = arith.constant 0.000000e+00 : f32
    %27 = vector.broadcast %cst_23 : f32 to vector<128x128xf32>
    %28 = arith.maximumf %26, %27 : vector<128x128xf32>
    %c0_24 = arith.constant 0 : index
    %c0_25 = arith.constant 0 : index
    %29 = vector.load %arg10[%c0_24, %c0_25] : memref<1x128xf32, #tpu.memory_space<vmem>>, vector<1x128xf32>
    %30 = tpu.transpose %28, [1, 0] : vector<128x128xf32> -> vector<128x128xf32>
    %cst_26 = arith.constant dense<0.000000e+00> : vector<1x128xf32>
    %31 = tpu.matmul %29, %30, %cst_26 {dimension_numbers = #tpu.dot_dimension_numbers<[1], [0], [0], [1], [0, 0, 1, 1], [], []>} : vector<1x128xf32>, vector<128x128xf32>, vector<1x128xf32> -> vector<1x128xf32>
    %c0_27 = arith.constant 0 : index
    %c0_28 = arith.constant 0 : index
    %32 = vector.load %arg11[%c0_27, %c0_28] : memref<1x1xf32, #tpu.memory_space<vmem>>, vector<1x1xf32>
    %33 = vector.broadcast %32 : vector<1x1xf32> to vector<1x128xf32>
    %34 = arith.addf %31, %33 : vector<1x128xf32>
    %35 = vector.shape_cast %34 : vector<1x128xf32> to vector<1x1x128xf32>
    %c0_29 = arith.constant 0 : index
    %c0_30 = arith.constant 0 : index
    %c0_31 = arith.constant 0 : index
    %36 = vector.load %arg12[%c0_29, %c0_30, %c0_31] : memref<1x1x128xf32, #tpu.memory_space<vmem>>, vector<1x1x128xf32>
    tpu.vector_store %arg12[%c0_29, %c0_30, %c0_31], %35 {strides = array<i32>} : memref<1x1x128xf32, #tpu.memory_space<vmem>>, vector<1x1x128xf32>,
    return
  }
  func.func @transform_0(%arg0: i32) -> (i32, i32) {
    %c0_i32 = arith.constant 0 : i32
    %c0_i32_0 = arith.constant 0 : i32
    return %arg0, %c0_i32 : i32, i32
  }
  func.func @transform_1(%arg0: i32) -> (i32, i32) {
    %c0_i32 = arith.constant 0 : i32
    %c0_i32_0 = arith.constant 0 : i32
    %c0_i32_1 = arith.constant 0 : i32
    return %c0_i32, %c0_i32_0 : i32, i32
  }
  func.func @transform_2(%arg0: i32) -> (i32, i32) {
    %c0_i32 = arith.constant 0 : i32
    %c0_i32_0 = arith.constant 0 : i32
    %c0_i32_1 = arith.constant 0 : i32
    return %c0_i32, %c0_i32_0 : i32, i32
  }
  func.func @transform_3(%arg0: i32) -> (i32, i32) {
    %c0_i32 = arith.constant 0 : i32
    %c0_i32_0 = arith.constant 0 : i32
    %c0_i32_1 = arith.constant 0 : i32
    return %c0_i32, %c0_i32_0 : i32, i32
  }
  func.func @transform_4(%arg0: i32) -> (i32, i32) {
    %c0_i32 = arith.constant 0 : i32
    %c0_i32_0 = arith.constant 0 : i32
    %c0_i32_1 = arith.constant 0 : i32
    return %c0_i32, %c0_i32_0 : i32, i32
  }
  func.func @transform_5(%arg0: i32) -> (i32, i32) {
    %c0_i32 = arith.constant 0 : i32
    %c0_i32_0 = arith.constant 0 : i32
    %c0_i32_1 = arith.constant 0 : i32
    return %c0_i32, %c0_i32_0 : i32, i32
  }
  func.func @transform_6(%arg0: i32) -> (i32, i32) {
    %c0_i32 = arith.constant 0 : i32
    %c0_i32_0 = arith.constant 0 : i32
    %c0_i32_1 = arith.constant 0 : i32
    return %c0_i32, %c0_i32_0 : i32, i32
  }
  func.func @transform_7(%arg0: i32) -> (i32, i32) {
    %c0_i32 = arith.constant 0 : i32
    %c0_i32_0 = arith.constant 0 : i32
    %c0_i32_1 = arith.constant 0 : i32
    return %c0_i32, %c0_i32_0 : i32, i32
  }
  func.func @transform_8(%arg0: i32) -> (i32, i32) {
    %c0_i32 = arith.constant 0 : i32
    %c0_i32_0 = arith.constant 0 : i32
    %c0_i32_1 = arith.constant 0 : i32
    return %c0_i32, %c0_i32_0 : i32, i32
  }
  func.func @transform_9(%arg0: i32) -> (i32, i32) {
    %c0_i32 = arith.constant 0 : i32
    %c0_i32_0 = arith.constant 0 : i32
    %c0_i32_1 = arith.constant 0 : i32
    return %c0_i32, %c0_i32_0 : i32, i32
  }
  func.func @transform_10(%arg0: i32) -> (i32, i32) {
    %c0_i32 = arith.constant 0 : i32
    %c0_i32_0 = arith.constant 0 : i32
    %c0_i32_1 = arith.constant 0 : i32
    return %c0_i32, %c0_i32_0 : i32, i32
  }
  func.func @transform_11(%arg0: i32) -> (i32, i32, i32) {
    %c0_i32 = arith.constant 0 : i32
    %c0_i32_0 = arith.constant 0 : i32
    %c0_i32_1 = arith.constant 0 : i32
    return %arg0, %c0_i32, %c0_i32_0 : i32, i32, i32
  }
}

</mosaic_0001>

<bundles_post_ra>
// kernel: regression_network_forward.1
= control target key start
LH: loop header
LB: loop body
LE: loop exit
PB: predicated region body
PF: predicated region fallthrough
CT: control target
= control target key end

     0   :  { %s2520_s0 = inlined_call_operand.vmem [shape: f32[300,175], index: 0, kind: input, shape index: {}]   ;;  %s2521_s1 = inlined_call_operand.vmem [shape: f32[175,128], index: 1, kind: input, shape index: {}]   ;;  %s2522_s2 = inlined_call_operand.vmem [shape: f32[1,128], index: 2, kind: input, shape index: {}]   ;;  %s2523_s3 = inlined_call_operand.vmem [shape: f32[128,128], index: 3, kind: input, shape index: {}]   ;;  %s2524_s4 = inlined_call_operand.vmem [shape: f32[1,128], index: 4, kind: input, shape index: {}]   ;;  %s2525_s5 = inlined_call_operand.vmem [shape: f32[128,128], index: 5, kind: input, shape index: {}]   ;;  %s2526_s6 = inlined_call_operand.vmem [shape: f32[1,128], index: 6, kind: input, shape index: {}]   ;;  %s2527_s7 = inlined_call_operand.vmem [shape: f32[128,128], index: 7, kind: input, shape index: {}]   ;;  %s2528_s8 = inlined_call_operand.vmem [shape: f32[1,128], index: 8, kind: input, shape index: {}]   ;;  %s2529_s9 = inlined_call_operand.vmem [shape: f32[1,128], index: 9, kind: input, shape index: {}]   ;;  %s2530_s10 = inlined_call_operand.<no memory space> [shape: f32[1,1], index: 10, kind: input, shape index: {}]   ;;  %s2531_s11 = inlined_call_operand.hbm [shape: f32[3,1,128], index: 11, kind: output, shape index: {}]  }
   0x1   :  { %v16_v0 = vstv %s2530_s10 }
   0x2   :  { %17 = vst [vmem:[#allocation2] sm:$0x1] %v16_v0 }
   0x3   :  { %18 = vsyncpa [#allocation4], 0 }
   0x4   :  { %20 = vsyncpa [#allocation4 + $0x1], 0  ;;  %s2073_s19 = smov 0   ;;  %s2075_s20 = smov 0  }
   0x5   :  { %s2077_s21 = smov 0   ;;  %s2079_s22 = smov 0  }
   0x6 LB: > { %s1392_s10 = sadd.s32 4294967295, %s2002_s22   ;;  %s1393_s23 = sadd.s32 4294967294, %s2002_s22   ;;  %s2002_s22 = sphi %s2079_s22, %s2537_s22   ;;  %s1998_s21 = sphi %s2077_s21, %s2536_s21   ;;  %s1994_s20 = sphi %s2075_s20, %s2535_s20   ;;  %s1990_s19 = sphi %s2073_s19, %s2534_s19  }
   0x7   : > { %s2096_s24 = sadd.s32 1, %s2002_s22   ;;  %s269_s25 = sadd.s32 1, %s1998_s21 }
   0x8   : > { %s266_s26 = ssub.s32 %s2002_s22, %s2096_s24  ;;  %p279_p0 = scmp.ne.s32.totalorder %s1998_s21, %s1994_s20 }
   0x9   : > { %p267_p1 = scmp.eq.s32.totalorder %s266_s26, 0  ;;  %p280_p2 = scmp.eq.s32.totalorder %s1392_s10, 2 }
   0xa   : > { %p285_p3 = scmp.ne.s32.totalorder %s1994_s20, %s1990_s19  ;;  %p286_p4 = scmp.eq.s32.totalorder %s1393_s23, 2 }
   0xb   : > { %s2106_s27 = scalar_select %p267_p1, %s1998_s21, %s269_s25  }
   0xc   : > { %p2108_p5 = por %p280_p2, %p279_p0  ;;  %p2112_p6 = por %p286_p4, %p285_p3 }
   0xd   : > { %p1396_p7 = scmp.ge.s32.totalorder %s2002_s22, 1  ;;  %p354_p8 = scmp.lt.s32.totalorder %s2002_s22, 4 }
   0xf   : > { %p355_p9 = pnand %p1396_p7, %p354_p8 }
  0x10   : > { %v448_v1 = vld [vmem:[%s2521_s1] sm:$0xff] (!%p355_p9)  ;;  %v449_v2 = vld [vmem:[%s2521_s1 + $0x8] sm:$0xff] (!%p355_p9)  ;;  %v450_v3 = vld [vmem:[%s2521_s1 + $0x10] sm:$0xff] (!%p355_p9)  ;;  %v2004_v4 = vmov (!%p355_p9), 0.0|0.0   ;;  %s2131_s23 = sshll.u32 (!%p355_p9), %s1392_s10, 4  ;;  %vm477_vm0 = vcmask (!%p355_p9), 384000  }
  0x11   : > { %358 = sbr.rel (%p355_p9) target bundleno = 1228 (0x4cc), region = 64  ;;  %1741 = vmatprep.subr.bf16.mxu0 (!%p355_p9), %v2004_v4  ;;  %v1742_v5 = vpack.c.bf16 (!%p355_p9), %v449_v2, %v448_v1  ;;  %v451_v6 = vld [vmem:[%s2521_s1 + $0x18] sm:$0xff] (!%p355_p9)  ;;  %p405_p10 = scmp.lt.s32.totalorder (!%p355_p9), %s2131_s23, 37  ;;  %v452_v8 = vld [vmem:[%s2521_s1 + $0x20] sm:$0xff] (!%p355_p9)  ;;  %v453_v9 = vld [vmem:[%s2521_s1 + $0x28] sm:$0xff] (!%p355_p9)  ;;  %vm526_vm1 = vcmask (!%p355_p9), 1046528  }
  0x12   : > { %v1745_v7 = vpack.c.bf16 (!%p355_p9), %v451_v6, %v450_v3  ;;  %v1748_v10 = vpack.c.bf16 (!%p355_p9), %v453_v9, %v452_v8  ;;  %v454_v11 = vld [vmem:[%s2521_s1 + $0x30] sm:$0xff] (!%p355_p9)  ;;  %v455_v12 = vld [vmem:[%s2521_s1 + $0x38] sm:$0xff] (!%p355_p9)  ;;  %v456_v15 = vld [vmem:[%s2521_s1 + $0x40] sm:$0xff] (!%p355_p9)  ;;  %vm2005_vm2 = vmmov (!%p355_p9), 1   ;;  %vm2006_vm4 = vmmov (!%p355_p9), 0   ;;  %s397_s18 = sand.u32 (!%p355_p9), 1, %s1994_s20   ;;  %s2478_s12 = scalar_lea.hbm (!%p355_p9), %s2531_s11, %s2131_s23 }
  0x13   : > { %1743 = vmatpush1.bf16.msra.mxu0 (!%p355_p9), %v1742_v5  ;;  %v1751_v14 = vpack.c.bf16 (!%p355_p9), %v455_v12, %v454_v11  ;;  %v457_v16 = vld [vmem:[%s2521_s1 + $0x48] sm:$0xff] (!%p355_p9)  ;;  %v458_v18 = vld [vmem:[%s2521_s1 + $0x50] sm:$0xff] (!%p355_p9)  ;;  %v459_v19 = vld [vmem:[%s2521_s1 + $0x58] sm:$0xff] (!%p355_p9)  ;;  %s398_s25 = scalar_lea.vmem (!%p355_p9), [#allocation3], %s397_s18  ;;  %s2009_s10 = smov (!%p355_p9), [#allocation3]  }
  0x14   : > { %1744 = vmatprep.subr.bf16.mxu0 (!%p355_p9), %v2004_v4  ;;  %v1754_v17 = vpack.c.bf16 (!%p355_p9), %v457_v16, %v456_v15  ;;  %v691_v20 = vld [vmem:[%s2523_s3] sm:$0xff] (!%p355_p9)  ;;  %v692_v21 = vld [vmem:[%s2523_s3 + $0x8] sm:$0xff] (!%p355_p9)  ;;  %v1757_v22 = vpack.c.bf16 (!%p355_p9), %v459_v19, %v458_v18  ;;  %v693_v25 = vld [vmem:[%s2523_s3 + $0x10] sm:$0xff] (!%p355_p9)  ;;  %s1338_s26 = sshll.u32 (!%p355_p9), %s398_s25, 4  ;;  %s1944_s15 = sshll.u32 (!%p355_p9), %s2009_s10, 4  ;;  %s2480_s26 = int_to_ptr.vmem [resolvable:$true] %s1338_s26  ;;  %s1945_s15 = int_to_ptr.vmem [resolvable:$false] %s1944_s15 }
  0x15   : > { %v460_v23 = vld [vmem:[%s2521_s1 + $0x60] sm:$0xff] (!%p355_p9)  ;;  %v1775_v24 = vpack.c.bf16 (!%p355_p9), %v692_v21, %v691_v20  ;;  %v694_v26 = vld [vmem:[%s2523_s3 + $0x18] sm:$0xff] (!%p355_p9)  ;;  %v461_v27 = vld [vmem:[%s2521_s1 + $0x68] sm:$0xff] (!%p355_p9)  ;;  %s1946_s17 = scalar_lea.vmem (!%p355_p9), %s1945_s15, 32  ;;  %p1947_p0 = scmp.lt.s32.totalorder (!%p355_p9), %s2480_s26, %s1945_s15 }
  0x16   : > { %v1779_v28 = vpack.c.bf16 (!%p355_p9), %v694_v26, %v693_v25  ;;  %v695_v29 = vld [vmem:[%s2523_s3 + $0x20] sm:$0xff] (!%p355_p9)  ;;  %v696_v30 = vld [vmem:[%s2523_s3 + $0x28] sm:$0xff] (!%p355_p9)  ;;  %v1760_v31 = vpack.c.bf16 (!%p355_p9), %v461_v27, %v460_v23  ;;  %v462_v32 = vld [vmem:[%s2521_s1 + $0x70] sm:$0xff] (!%p355_p9) }
  0x17   : > { %1746 = vmatpush1.bf16.msra.mxu0 (!%p355_p9), %v1745_v7  ;;  %1776 = vmatprep.subr.bf16.mxu1 (!%p355_p9), %v1775_v24  ;;  %v1783_v33 = vpack.c.bf16 (!%p355_p9), %v696_v30, %v695_v29  ;;  %v463_v34 = vld [vmem:[%s2521_s1 + $0x78] sm:$0xff] (!%p355_p9)  ;;  %v697_v35 = vld [vmem:[%s2523_s3 + $0x30] sm:$0xff] (!%p355_p9)  ;;  %v464_v38 = vld [vmem:[%s2521_s1 + $0x80] sm:$0xff] (!%p355_p9) }
  0x18   : > { %s406_s13 = scalar_select %p405_p10, %s2131_s23, 37  ;;  %1747 = vmatprep.subr.bf16.mxu0 %v2004_v4  ;;  %1778 = vmatpush3.bf16.msra.mxu1 %v1775_v24  ;;  %v698_v36 = vld [vmem:[%s2523_s3 + $0x38] sm:$0xff]  ;;  %v1763_v37 = vpack.c.bf16 %v463_v34, %v462_v32  ;;  %v465_v40 = vld [vmem:[%s2521_s1 + $0x88] sm:$0xff]  ;;  %v699_v41 = vld [vmem:[%s2523_s3 + $0x40] sm:$0xff] }
  0x19   : > { %1780 = vmatprep.subr.bf16.mxu1 %v1779_v28  ;;  %v1787_v39 = vpack.c.bf16 %v698_v36, %v697_v35  ;;  %v700_v42 = vld [vmem:[%s2523_s3 + $0x48] sm:$0xff]  ;;  %v1766_v43 = vpack.c.bf16 %v465_v40, %v464_v38  ;;  %v466_v44 = vld [vmem:[%s2521_s1 + $0x90] sm:$0xff]  ;;  %v467_v46 = vld [vmem:[%s2521_s1 + $0x98] sm:$0xff] }
  0x1a   : > { %s1424_s14 = sshll.u32 %s406_s13, 4  ;;  %v1791_v45 = vpack.c.bf16 %v700_v42, %v699_v41  ;;  %v701_v47 = vld [vmem:[%s2523_s3 + $0x50] sm:$0xff]  ;;  %v702_v48 = vld [vmem:[%s2523_s3 + $0x58] sm:$0xff]  ;;  %v1769_v49 = vpack.c.bf16 %v467_v46, %v466_v44  ;;  %v468_v51 = vld [vmem:[%s2521_s1 + $0xa0] sm:$0xff]  ;;  %s1326_s13 = scalar_lea.sflag [#allocation4], %s397_s18 }
  0x1b   : > { %s2145_s16 = scalar_lea.vmem %s2520_s0, %s1424_s14  ;;  %1749 = vmatpush1.bf16.msra.mxu0 %v1748_v10  ;;  %v1795_v50 = vpack.c.bf16 %v702_v48, %v701_v47  ;;  %v469_v52 = vld [vmem:[%s2521_s1 + $0xa8] sm:$0x7f]  ;;  %vm1773_vm3 = vmpackc.low %vm526_vm1, %vm2005_vm2  ;;  %v705_v25 = vld [vmem:[%s2523_s3 + $0x70] sm:$0xff]  ;;  %s1940_s14 = scalar_lea.vmem %s2480_s26, 16 }
  0x1c   : > { %v417_v13 = vld [vmem:[%s2145_s16 + $0x8] sm:$0xff]  ;;  %1750 = vmatprep.subr.bf16.mxu0 %v2004_v4  ;;  %1782 = vmatpush3.bf16.msra.mxu1 %v1779_v28  ;;  %v1772_v53 = vpack.c.bf16 %v469_v52, %v468_v51  ;;  %v416_v54 = vld [vmem:[%s2145_s16] sm:$0xff]  ;;  %v419_v55 = vld [vmem:[%s2145_s16 + $0x18] sm:$0xff]  ;;  %p1941_p11 = scmp.ne.s32.totalorder %s2480_s26, %s1940_s14  ;;  %p1948_p1 = scmp.lt.s32.totalorder %s1946_s17, %s1940_s14 }
  0x1d   : > { %1402 = vmatprep.mubr.msk.f32.mxu0 %vm477_vm0, %v417_v13  ;;  %1784 = vmatprep.subr.bf16.mxu1 %v1783_v33  ;;  %v418_v56 = vld [vmem:[%s2145_s16 + $0x10] sm:$0xff]  ;;  %v421_v57 = vld [vmem:[%s2145_s16 + $0x28] sm:$0xff]  ;;  %v420_v58 = vld [vmem:[%s2145_s16 + $0x20] sm:$0xff] }
  0x1e   : > { %v423_v59 = vld [vmem:[%s2145_s16 + $0x38] sm:$0xff]  ;;  %v422_v60 = vld [vmem:[%s2145_s16 + $0x30] sm:$0xff]  ;;  %v425_v61 = vld [vmem:[%s2145_s16 + $0x48] sm:$0xff]  ;;  %p1942_p12 = pnand %p1941_p11, %p2108_p5  ;;  %p1949_p2 = por %p1948_p1, %p1947_p0 }
  0x1f   : > { %1752 = vmatpush1.bf16.msra.mxu0 %v1751_v14  ;;  %v424_v62 = vld [vmem:[%s2145_s16 + $0x40] sm:$0xff]  ;;  %v427_v63 = vld [vmem:[%s2145_s16 + $0x58] sm:$0xff]  ;;  %v426_v0 = vld [vmem:[%s2145_s16 + $0x50] sm:$0xff] }
  0x20   : > { %1753 = vmatprep.subr.bf16.mxu0 %v2004_v4  ;;  %1786 = vmatpush3.bf16.msra.mxu1 %v1783_v33  ;;  %v429_v1 = vld [vmem:[%s2145_s16 + $0x68] sm:$0xff]  ;;  %v428_v2 = vld [vmem:[%s2145_s16 + $0x60] sm:$0xff]  ;;  %v431_v3 = vld [vmem:[%s2145_s16 + $0x78] sm:$0xff]  ;;  %p1943_p13 = pneg %p1942_p12 }
  0x21   : > { %1788 = vmatprep.subr.bf16.mxu1 %v1787_v39  ;;  %v430_v5 = vld [vmem:[%s2145_s16 + $0x70] sm:$0xff]  ;;  %v433_v6 = vld [vmem:[%s2145_s16 + $0x88] sm:$0xff]  ;;  %v432_v7 = vld [vmem:[%s2145_s16 + $0x80] sm:$0xff] }
  0x22   : > { %v435_v8 = vld [vmem:[%s2145_s16 + $0x98] sm:$0xff]  ;;  %v434_v9 = vld [vmem:[%s2145_s16 + $0x90] sm:$0xff]  ;;  %v437_v10 = vld [vmem:[%s2145_s16 + $0xa8] sm:$0xff]  ;;  %p1950_p3 = pnand %p1949_p2, %p1943_p13 }
  0x23   : > { %1755 = vmatpush1.bf16.msra.mxu0 %v1754_v17  ;;  %v436_v11 = vld [vmem:[%s2145_s16 + $0xa0] sm:$0xff]  ;;  %v439_v12 = vld [vmem:[%s2145_s16 + $0xb8] sm:$0xff]  ;;  %v438_v13 = vld [vmem:[%s2145_s16 + $0xb0] sm:$0xff] }
  0x24   : > { %1756 = vmatprep.subr.bf16.mxu0 %v2004_v4  ;;  %1790 = vmatpush3.bf16.msra.mxu1 %v1787_v39  ;;  %v441_v14 = vld [vmem:[%s2145_s16 + $0xc8] sm:$0xff]  ;;  %v440_v15 = vld [vmem:[%s2145_s16 + $0xc0] sm:$0xff]  ;;  %v443_v16 = vld [vmem:[%s2145_s16 + $0xd8] sm:$0xff] }
  0x25   : > { %1792 = vmatprep.subr.bf16.mxu1 %v1791_v45  ;;  %v442_v17 = vld [vmem:[%s2145_s16 + $0xd0] sm:$0xff]  ;;  %v445_v18 = vld [vmem:[%s2145_s16 + $0xe8] sm:$0xff]  ;;  %v444_v19 = vld [vmem:[%s2145_s16 + $0xe0] sm:$0xff] }
  0x26   : > { %v447_v20 = vld [vmem:[%s2145_s16 + $0xf8] sm:$0xff]  ;;  %v446_v21 = vld [vmem:[%s2145_s16 + $0xf0] sm:$0xff]  ;;  %v704_v23 = vld [vmem:[%s2523_s3 + $0x68] sm:$0xff] }
  0x27   : > { %1758 = vmatpush1.bf16.msra.mxu0 %v1757_v22  ;;  %v703_v22 = vld [vmem:[%s2523_s3 + $0x60] sm:$0xff]  ;;  %v706_v26 = vld [vmem:[%s2523_s3 + $0x78] sm:$0xff]  ;;  %v876_v29 = vld [vmem:[%s2525_s5 + $0x8] sm:$0xff] }
  0x28   : > { %1759 = vmatprep.subr.bf16.mxu0 %v2004_v4  ;;  %1794 = vmatpush3.bf16.msra.mxu1 %v1791_v45  ;;  %v1799_v24 = vpack.c.bf16 %v704_v23, %v703_v22  ;;  %v1803_v27 = vpack.c.bf16 %v706_v26, %v705_v25  ;;  %v875_v28 = vld [vmem:[%s2525_s5] sm:$0xff]  ;;  %v878_v38 = vld [vmem:[%s2525_s5 + $0x18] sm:$0xff]  ;;  %v880_v45 = vld [vmem:[%s2525_s5 + $0x28] sm:$0xff] }
  0x29   : > { %1796 = vmatprep.subr.bf16.mxu1 %v1795_v50  ;;  %v1807_v30 = vpack.c.bf16 %v876_v29, %v875_v28  ;;  %v879_v44 = vld [vmem:[%s2525_s5 + $0x20] sm:$0xff]  ;;  %v881_v51 = vld [vmem:[%s2525_s5 + $0x30] sm:$0xff]  ;;  %v882_v52 = vld [vmem:[%s2525_s5 + $0x38] sm:$0xff] }
  0x2b   : > { %1761 = vmatpush1.bf16.msra.mxu0 %v1760_v31  ;;  %v2310_v31 = vld [vmem:[%s2522_s2] ss:$0 sm:$0xff] }
  0x2c   : > { %1762 = vmatprep.subr.bf16.mxu0 %v2004_v4  ;;  %1798 = vmatpush3.bf16.msra.mxu1 %v1795_v50 }
  0x2d   : > { %1800 = vmatprep.subr.bf16.mxu1 %v1799_v24 }
  0x2f   : > { %1764 = vmatpush1.bf16.msra.mxu0 %v1763_v37  ;;  %v877_v37 = vld [vmem:[%s2525_s5 + $0x10] sm:$0xff] }
  0x30   : > { %1765 = vmatprep.subr.bf16.mxu0 %v2004_v4  ;;  %1802 = vmatpush3.bf16.msra.mxu1 %v1799_v24  ;;  %v1811_v42 = vpack.c.bf16 %v878_v38, %v877_v37 }
  0x31   : > { %1804 = vmatprep.subr.bf16.mxu1 %v1803_v27 }
  0x33   : > { %1767 = vmatpush1.bf16.msra.mxu0 %v1766_v43 }
  0x34   : > { %1768 = vmatprep.subr.bf16.mxu0 %v2004_v4  ;;  %1806 = vmatpush3.bf16.msra.mxu1 %v1803_v27 }
  0x35   : > { %1808 = vmatprep.subr.bf16.mxu1 %v1807_v30 }
  0x37   : > { %1770 = vmatpush1.bf16.msra.mxu0 %v1769_v49  ;;  %v1815_v49 = vpack.c.bf16 %v880_v45, %v879_v44 }
  0x38   : > { %1771 = vmatprep.subr.bf16.mxu0 %v2004_v4 }
  0x3b   : > { %1774 = vmatpush1.bf16.msk.msra.mxu0 %vm1773_vm3, %v1772_v53 }
  0x3c   : > { %1871 = vmatprep.subr.bf16.mxu0 %v2004_v4 }
  0x3e   : > { %595 = vmatmul.mubr.f32.vlgmr.msra.gmra.mrb[0].mxu0 %v416_v54 }
  0x3f   : > { %1403 = vmatprep.mubr.msk.f32.mxu0 %vm477_vm0, %v419_v55 }
  0x42   : > { %600 = vmatmul.mubr.f32.gmra.mrb[2].mxu0 %v418_v56  ;;  %v1819_v56 = vpack.c.bf16 %v882_v52, %v881_v51  ;;  %v889_v52 = vld [vmem:[%s2525_s5 + $0x70] sm:$0xff] }
  0x43   : > { %1404 = vmatprep.mubr.msk.f32.mxu0 %vm477_vm0, %v421_v57 }
  0x46   : > { %605 = vmatmul.mubr.f32.gmra.mrb[4].mxu0 %v420_v58  ;;  %v883_v58 = vld [vmem:[%s2525_s5 + $0x40] sm:$0xff] }
  0x47   : > { %1405 = vmatprep.mubr.msk.f32.mxu0 %vm477_vm0, %v423_v59  ;;  %v884_v59 = vld [vmem:[%s2525_s5 + $0x48] sm:$0xff] }
  0x4a   : > { %610 = vmatmul.mubr.f32.gmra.mrb[6].mxu0 %v422_v60 }
  0x4b   : > { %1406 = vmatprep.mubr.msk.f32.mxu0 %vm477_vm0, %v425_v61 }
  0x4e   : > { %615 = vmatmul.mubr.f32.gmra.mrb[8].mxu0 %v424_v62 }
  0x4f   : > { %1407 = vmatprep.mubr.msk.f32.mxu0 %vm477_vm0, %v427_v63  ;;  %v1823_v63 = vpack.c.bf16 %v884_v59, %v883_v58 }
  0x52   : > { %620 = vmatmul.mubr.f32.gmra.mrb[10].mxu0 %v426_v0 }
  0x53   : > { %1408 = vmatprep.mubr.msk.f32.mxu0 %vm477_vm0, %v429_v1  ;;  %v885_v1 = vld [vmem:[%s2525_s5 + $0x50] sm:$0xff] }
  0x56   : > { %625 = vmatmul.mubr.f32.gmra.mrb[12].mxu0 %v428_v2  ;;  %v886_v2 = vld [vmem:[%s2525_s5 + $0x58] sm:$0xff] }
  0x57   : > { %1409 = vmatprep.mubr.msk.f32.mxu0 %vm477_vm0, %v431_v3 }
  0x5a   : > { %630 = vmatmul.mubr.f32.gmra.mrb[14].mxu0 %v430_v5 }
  0x5b   : > { %1410 = vmatprep.mubr.msk.f32.mxu0 %vm477_vm0, %v433_v6 }
  0x5e   : > { %635 = vmatmul.mubr.f32.gmra.mrb[16].mxu0 %v432_v7  ;;  %v1827_v7 = vpack.c.bf16 %v886_v2, %v885_v1 }
  0x5f   : > { %1411 = vmatprep.mubr.msk.f32.mxu0 %vm477_vm0, %v435_v8 }
  0x62   : > { %640 = vmatmul.mubr.f32.gmra.mrb[18].mxu0 %v434_v9  ;;  %v887_v9 = vld [vmem:[%s2525_s5 + $0x60] sm:$0xff] }
  0x63   : > { %1412 = vmatprep.mubr.msk.f32.mxu0 %vm477_vm0, %v437_v10  ;;  %v888_v10 = vld [vmem:[%s2525_s5 + $0x68] sm:$0xff] }
  0x66   : > { %645 = vmatmul.mubr.f32.gmra.mrb[20].mxu0 %v436_v11 }
  0x67   : > { %1413 = vmatprep.mubr.msk.f32.mxu0 %vm477_vm0, %v439_v12 }
  0x6a   : > { %650 = vmatmul.mubr.f32.gmra.mrb[22].mxu0 %v438_v13 }
  0x6b   : > { %1414 = vmatprep.mubr.msk.f32.mxu0 %vm477_vm0, %v441_v14  ;;  %v1831_v14 = vpack.c.bf16 %v888_v10, %v887_v9 }
  0x6e   : > { %655 = vmatmul.mubr.f32.gmra.mrb[24].mxu0 %v440_v15 }
  0x6f   : > { %1415 = vmatprep.mubr.msk.f32.mxu0 %vm477_vm0, %v443_v16 }
  0x72   : > { %660 = vmatmul.mubr.f32.gmra.mrb[26].mxu0 %v442_v17 }
  0x73   : > { %1416 = vmatprep.mubr.msk.f32.mxu0 %vm477_vm0, %v445_v18 }
  0x76   : > { %665 = vmatmul.mubr.f32.gmra.mrb[28].mxu0 %v444_v19 }
  0x77   : > { %1417 = vmatprep.mubr.msk.f32.mxu0 %vm477_vm0, %v447_v20 }
  0x7a   : > { %670 = vmatmul.mubr.f32.gmra.mrb[30].mxu0 %v446_v21 }
 0x111   : > { %v596_v32 = vpop.f32.mrb[0].mxu0 }
 0x112   : > { %v598_v33 = vpop.f32.mrb[1].mxu0  ;;  %v597_v34 = vadd.f32 %v2310_v31, %v596_v32 }
 0x114   : > { %v675_v35 = vmax.f32 %v597_v34, 0.0 }
 0x115   : > { %v601_v36 = vpop.f32.mrb[2].mxu0 }
 0x116   : > { %v602_v39 = vadd.f32 %v2310_v31, %v601_v36  ;;  %v603_v40 = vpop.f32.mrb[3].mxu0  ;;  %1570 = vmatprep.mubr.f32.mxu1 %v675_v35 }
 0x118   : > { %v676_v41 = vmax.f32 %v602_v39, 0.0 }
 0x119   : > { %v606_v43 = vpop.f32.mrb[4].mxu0 }
 0x11a   : > { %v607_v46 = vadd.f32 %v2310_v31, %v606_v43  ;;  %v608_v47 = vpop.f32.mrb[5].mxu0  ;;  %1571 = vmatmul.mubr.f32.vlgmr.msra.gmra.mrb[0].mxu1 %v676_v41 }
 0x11b   : > { %1810 = vmatpush3.bf16.msra.mxu1 %v1807_v30 }
 0x11c   : > { %v677_v48 = vmax.f32 %v607_v46, 0.0  ;;  %1812 = vmatprep.subr.bf16.mxu1 %v1811_v42 }
 0x11d   : > { %v611_v50 = vpop.f32.mrb[6].mxu0 }
 0x11e   : > { %v612_v53 = vadd.f32 %v2310_v31, %v611_v50  ;;  %v613_v54 = vpop.f32.mrb[7].mxu0  ;;  %1573 = vmatprep.mubr.f32.mxu1 %v677_v48 }
 0x11f   : > { %1814 = vmatpush3.bf16.msra.mxu1 %v1811_v42 }
 0x120   : > { %v678_v55 = vmax.f32 %v612_v53, 0.0  ;;  %1816 = vmatprep.subr.bf16.mxu1 %v1815_v49  ;;  %v890_v53 = vld [vmem:[%s2525_s5 + $0x78] sm:$0xff] }
 0x121   : > { %v616_v57 = vpop.f32.mrb[8].mxu0  ;;  %v1835_v54 = vpack.c.bf16 %v890_v53, %v889_v52 }
 0x122   : > { %v617_v60 = vadd.f32 %v2310_v31, %v616_v57  ;;  %v618_v61 = vpop.f32.mrb[9].mxu0  ;;  %1574 = vmatmul.mubr.f32.gmra.mrb[2].mxu1 %v678_v55  ;;  %v1059_v55 = vld [vmem:[%s2527_s7] sm:$0xff] }
 0x123   : > { %1818 = vmatpush3.bf16.msra.mxu1 %v1815_v49  ;;  %v2379_v57 = vld [vmem:[%s2524_s4] ss:$0 sm:$0xff] }
 0x124   : > { %v679_v62 = vmax.f32 %v617_v60, 0.0  ;;  %1820 = vmatprep.subr.bf16.mxu1 %v1819_v56 }
 0x125   : > { %v621_v0 = vpop.f32.mrb[10].mxu0 }
 0x126   : > { %v622_v3 = vadd.f32 %v2310_v31, %v621_v0  ;;  %v623_v5 = vpop.f32.mrb[11].mxu0  ;;  %1576 = vmatprep.mubr.f32.mxu1 %v679_v62  ;;  %v1061_v62 = vld [vmem:[%s2527_s7 + $0x10] sm:$0xff] }
 0x127   : > { %1822 = vmatpush3.bf16.msra.mxu1 %v1819_v56  ;;  %v1064_v5 = vld [vmem:[%s2527_s7 + $0x28] sm:$0xff] }
 0x128   : > { %v680_v6 = vmax.f32 %v622_v3, 0.0  ;;  %1824 = vmatprep.subr.bf16.mxu1 %v1823_v63  ;;  %v1063_v3 = vld [vmem:[%s2527_s7 + $0x20] sm:$0xff] }
 0x129   : > { %v626_v8 = vpop.f32.mrb[12].mxu0  ;;  %v1847_v9 = vpack.c.bf16 %v1064_v5, %v1063_v3 }
 0x12a   : > { %v627_v11 = vadd.f32 %v2310_v31, %v626_v8  ;;  %v628_v12 = vpop.f32.mrb[13].mxu0  ;;  %1577 = vmatmul.mubr.f32.gmra.mrb[4].mxu1 %v680_v6 }
 0x12b   : > { %1826 = vmatpush3.bf16.msra.mxu1 %v1823_v63  ;;  %v1062_v63 = vld [vmem:[%s2527_s7 + $0x18] sm:$0xff] }
 0x12c   : > { %v681_v13 = vmax.f32 %v627_v11, 0.0  ;;  %1828 = vmatprep.subr.bf16.mxu1 %v1827_v7  ;;  %v1843_v2 = vpack.c.bf16 %v1062_v63, %v1061_v62  ;;  %v1065_v11 = vld [vmem:[%s2527_s7 + $0x30] sm:$0xff]  ;;  %v1066_v12 = vld [vmem:[%s2527_s7 + $0x38] sm:$0xff] }
 0x12d   : > { %v631_v15 = vpop.f32.mrb[14].mxu0  ;;  %v1073_v62 = vld [vmem:[%s2527_s7 + $0x70] sm:$0xff]  ;;  %v1074_v63 = vld [vmem:[%s2527_s7 + $0x78] sm:$0xff] }
 0x12e   : > { %v632_v16 = vadd.f32 %v2310_v31, %v631_v15  ;;  %v633_v17 = vpop.f32.mrb[15].mxu0  ;;  %1579 = vmatprep.mubr.f32.mxu1 %v681_v13  ;;  %v1851_v15 = vpack.c.bf16 %v1066_v12, %v1065_v11 }
 0x12f   : > { %1830 = vmatpush3.bf16.msra.mxu1 %v1827_v7  ;;  %v1068_v17 = vld [vmem:[%s2527_s7 + $0x48] sm:$0xff] }
 0x130   : > { %v682_v18 = vmax.f32 %v632_v16, 0.0  ;;  %1832 = vmatprep.subr.bf16.mxu1 %v1831_v14  ;;  %v1067_v16 = vld [vmem:[%s2527_s7 + $0x40] sm:$0xff] }
 0x131   : > { %v636_v19 = vpop.f32.mrb[16].mxu0 }
 0x132   : > { %v637_v20 = vadd.f32 %v2310_v31, %v636_v19  ;;  %v638_v21 = vpop.f32.mrb[17].mxu0  ;;  %1580 = vmatmul.mubr.f32.gmra.mrb[6].mxu1 %v682_v18 }
 0x133   : > { %1834 = vmatpush3.bf16.msra.mxu1 %v1831_v14  ;;  %v1855_v21 = vpack.c.bf16 %v1068_v17, %v1067_v16 }
 0x134   : > { %v683_v22 = vmax.f32 %v637_v20, 0.0  ;;  %1836 = vmatprep.subr.bf16.mxu1 %v1835_v54 }
 0x135   : > { %v641_v23 = vpop.f32.mrb[18].mxu0 }
 0x136   : > { %v642_v24 = vadd.f32 %v2310_v31, %v641_v23  ;;  %v643_v25 = vpop.f32.mrb[19].mxu0  ;;  %1582 = vmatprep.mubr.f32.mxu1 %v683_v22  ;;  %v1069_v23 = vld [vmem:[%s2527_s7 + $0x50] sm:$0xff] }
 0x137   : > { %1838 = vmatpush3.bf16.msra.mxu1 %v1835_v54 }
 0x138   : > { %v684_v26 = vmax.f32 %v642_v24, 0.0  ;;  %v1070_v24 = vld [vmem:[%s2527_s7 + $0x58] sm:$0xff] }
 0x139   : > { %v646_v27 = vpop.f32.mrb[20].mxu0 }
 0x13a   : > { %v647_v28 = vadd.f32 %v2310_v31, %v646_v27  ;;  %v648_v29 = vpop.f32.mrb[21].mxu0  ;;  %1583 = vmatmul.mubr.f32.gmra.mrb[8].mxu1 %v684_v26  ;;  %v1859_v27 = vpack.c.bf16 %v1070_v24, %v1069_v23 }
 0x13b   : > { %v1072_v29 = vld [vmem:[%s2527_s7 + $0x68] sm:$0xff] }
 0x13c   : > { %v685_v30 = vmax.f32 %v647_v28, 0.0  ;;  %v1071_v28 = vld [vmem:[%s2527_s7 + $0x60] sm:$0xff] }
 0x13d   : > { %v651_v32 = vpop.f32.mrb[22].mxu0 }
 0x13e   : > { %v652_v33 = vadd.f32 %v2310_v31, %v651_v32  ;;  %v653_v34 = vpop.f32.mrb[23].mxu0  ;;  %1585 = vmatprep.mubr.f32.mxu1 %v685_v30 }
 0x13f   : > { %v1863_v34 = vpack.c.bf16 %v1072_v29, %v1071_v28 }
 0x140   : > { %v686_v35 = vmax.f32 %v652_v33, 0.0 }
 0x141   : > { %v656_v36 = vpop.f32.mrb[24].mxu0 }
 0x142   : > { %v657_v37 = vadd.f32 %v2310_v31, %v656_v36  ;;  %v658_v38 = vpop.f32.mrb[25].mxu0  ;;  %1586 = vmatmul.mubr.f32.gmra.mrb[10].mxu1 %v686_v35 }
 0x144   : > { %v687_v39 = vmax.f32 %v657_v37, 0.0 }
 0x145   : > { %v661_v40 = vpop.f32.mrb[26].mxu0 }
 0x146   : > { %v662_v41 = vadd.f32 %v2310_v31, %v661_v40  ;;  %v663_v42 = vpop.f32.mrb[27].mxu0  ;;  %1588 = vmatprep.mubr.f32.mxu1 %v687_v39 }
 0x148   : > { %v688_v43 = vmax.f32 %v662_v41, 0.0 }
 0x149   : > { %v666_v44 = vpop.f32.mrb[28].mxu0 }
 0x14a   : > { %v667_v45 = vadd.f32 %v2310_v31, %v666_v44  ;;  %v668_v46 = vpop.f32.mrb[29].mxu0  ;;  %1589 = vmatmul.mubr.f32.gmra.mrb[12].mxu1 %v688_v43 }
 0x14c   : > { %v689_v47 = vmax.f32 %v667_v45, 0.0 }
 0x14d   : > { %v671_v48 = vpop.f32.mrb[30].mxu0 }
 0x14e   : > { %v672_v49 = vadd.f32 %v2310_v31, %v671_v48  ;;  %v673_v50 = vpop.f32.mrb[31].mxu0  ;;  %1591 = vmatprep.mubr.f32.mxu1 %v689_v47  ;;  %v1060_v31 = vld [vmem:[%s2527_s7 + $0x8] sm:$0xff] }
 0x14f   : > { %v1839_v56 = vpack.c.bf16 %v1060_v31, %v1059_v55 }
 0x150   : > { %v690_v51 = vmax.f32 %v672_v49, 0.0 }
 0x151   : > { %1840 = vmatprep.subr.bf16.mxu1 %v1839_v56 }
 0x152   : > { %1592 = vmatmul.mubr.f32.gmra.mrb[14].mxu1 %v690_v51 }
 0x1ed   : > { %v1572_v58 = vpop.f32.mrb[0].mxu1 }
 0x1ee   : > { %v786_v59 = vadd.f32 %v1572_v58, %v2379_v57  ;;  %v780_v60 = vpop.f32.mrb[1].mxu1 }
 0x1ef   : > { %v781_v61 = vadd.f32 %v2379_v57, %v780_v60 }
 0x1f0   : > { %v860_v1 = vmax.f32 %v786_v59, 0.0 }
 0x1f1   : > { %v859_v0 = vmax.f32 %v781_v61, 0.0 }
 0x1f3   : > { %1626 = vmatprep.mubr.f32.mxu1 %v859_v0  ;;  %v1867_v0 = vpack.c.bf16 %v1074_v63, %v1073_v62 }
 0x1f4   : > { %1627 = vmatmul.mubr.f32.vlgmr.msra.gmra.mrb[16].mxu1 %v860_v1  ;;  %v1419_v1 = vld [vmem:[%s2526_s6] ss:$0 sm:$0xff] }
 0x1f5   : > { %v1575_v6 = vpop.f32.mrb[2].mxu1  ;;  %1842 = vmatpush3.bf16.msra.mxu1 %v1839_v56 }
 0x1f6   : > { %v796_v7 = vadd.f32 %v1575_v6, %v2379_v57  ;;  %v790_v8 = vpop.f32.mrb[3].mxu1  ;;  %1844 = vmatprep.subr.bf16.mxu1 %v1843_v2 }
 0x1f7   : > { %v791_v10 = vadd.f32 %v2379_v57, %v790_v8 }
 0x1f8   : > { %v862_v14 = vmax.f32 %v796_v7, 0.0 }
 0x1f9   : > { %v861_v13 = vmax.f32 %v791_v10, 0.0  ;;  %1846 = vmatpush3.bf16.msra.mxu1 %v1843_v2 }
 0x1fa   : > { %1848 = vmatprep.subr.bf16.mxu1 %v1847_v9 }
 0x1fb   : > { %1629 = vmatprep.mubr.f32.mxu1 %v861_v13 }
 0x1fc   : > { %1630 = vmatmul.mubr.f32.gmra.mrb[18].mxu1 %v862_v14 }
 0x1fd   : > { %v1578_v18 = vpop.f32.mrb[4].mxu1  ;;  %1850 = vmatpush3.bf16.msra.mxu1 %v1847_v9 }
 0x1fe   : > { %v806_v19 = vadd.f32 %v1578_v18, %v2379_v57  ;;  %v800_v20 = vpop.f32.mrb[5].mxu1  ;;  %1852 = vmatprep.subr.bf16.mxu1 %v1851_v15 }
 0x1ff   : > { %v801_v22 = vadd.f32 %v2379_v57, %v800_v20 }
 0x200   : > { %v864_v26 = vmax.f32 %v806_v19, 0.0 }
 0x201   : > { %v863_v25 = vmax.f32 %v801_v22, 0.0  ;;  %1854 = vmatpush3.bf16.msra.mxu1 %v1851_v15 }
 0x202   : > { %1856 = vmatprep.subr.bf16.mxu1 %v1855_v21 }
 0x203   : > { %1632 = vmatprep.mubr.f32.mxu1 %v863_v25 }
 0x204   : > { %1633 = vmatmul.mubr.f32.gmra.mrb[20].mxu1 %v864_v26 }
 0x205   : > { %v1581_v30 = vpop.f32.mrb[6].mxu1  ;;  %1858 = vmatpush3.bf16.msra.mxu1 %v1855_v21 }
 0x206   : > { %v816_v32 = vadd.f32 %v1581_v30, %v2379_v57  ;;  %v810_v33 = vpop.f32.mrb[7].mxu1  ;;  %1860 = vmatprep.subr.bf16.mxu1 %v1859_v27 }
 0x207   : > { %v811_v35 = vadd.f32 %v2379_v57, %v810_v33 }
 0x208   : > { %v866_v37 = vmax.f32 %v816_v32, 0.0 }
 0x209   : > { %v865_v36 = vmax.f32 %v811_v35, 0.0  ;;  %1862 = vmatpush3.bf16.msra.mxu1 %v1859_v27 }
 0x20a   : > { %1864 = vmatprep.subr.bf16.mxu1 %v1863_v34 }
 0x20b   : > { %1635 = vmatprep.mubr.f32.mxu1 %v865_v36 }
 0x20c   : > { %1636 = vmatmul.mubr.f32.gmra.mrb[22].mxu1 %v866_v37 }
 0x20d   : > { %v1584_v38 = vpop.f32.mrb[8].mxu1  ;;  %1866 = vmatpush3.bf16.msra.mxu1 %v1863_v34 }
 0x20e   : > { %v826_v39 = vadd.f32 %v1584_v38, %v2379_v57  ;;  %v820_v40 = vpop.f32.mrb[9].mxu1  ;;  %1868 = vmatprep.subr.bf16.mxu1 %v1867_v0 }
 0x20f   : > { %v821_v41 = vadd.f32 %v2379_v57, %v820_v40 }
 0x210   : > { %v868_v43 = vmax.f32 %v826_v39, 0.0 }
 0x211   : > { %v867_v42 = vmax.f32 %v821_v41, 0.0  ;;  %1870 = vmatpush3.bf16.msra.mxu1 %v1867_v0 }
 0x213   : > { %1638 = vmatprep.mubr.f32.mxu1 %v867_v42 }
 0x214   : > { %1639 = vmatmul.mubr.f32.gmra.mrb[24].mxu1 %v868_v43 }
 0x215   : > { %v1587_v44 = vpop.f32.mrb[10].mxu1 }
 0x216   : > { %v836_v45 = vadd.f32 %v1587_v44, %v2379_v57  ;;  %v830_v46 = vpop.f32.mrb[11].mxu1 }
 0x217   : > { %v831_v47 = vadd.f32 %v2379_v57, %v830_v46 }
 0x218   : > { %v870_v49 = vmax.f32 %v836_v45, 0.0 }
 0x219   : > { %v869_v48 = vmax.f32 %v831_v47, 0.0 }
 0x21b   : > { %1641 = vmatprep.mubr.f32.mxu1 %v869_v48 }
 0x21c   : > { %1642 = vmatmul.mubr.f32.gmra.mrb[26].mxu1 %v870_v49 }
 0x21d   : > { %v1590_v50 = vpop.f32.mrb[12].mxu1 }
 0x21e   : > { %v846_v51 = vadd.f32 %v1590_v50, %v2379_v57  ;;  %v840_v52 = vpop.f32.mrb[13].mxu1 }
 0x21f   : > { %v841_v53 = vadd.f32 %v2379_v57, %v840_v52  ;;  %v1244_v52 = vld [vmem:[#allocation2] sm:$0x1] }
 0x220   : > { %v872_v55 = vmax.f32 %v846_v51, 0.0  ;;  %v2007_v51 = vmov 0.0  }
 0x221   : > { %v871_v54 = vmax.f32 %v841_v53, 0.0  ;;  %1738 = vmatprep.mubr.msk.f32.mxu0 %vm2006_vm4, %v2007_v51  ;;  %v2008_v53 = vmov 0  }
 0x222   : > { %1939 = vset.pattern.permute.xlu0 %v2008_v53 }
 0x223   : > { %1644 = vmatprep.mubr.f32.mxu1 %v871_v54  ;;  %1247 = vperm.xlu0 %1939, %v1244_v52   ;;  %v2445_v54 = vld [vmem:[%s2528_s8] ss:$0 sm:$0xff] }
 0x224   : > { %1645 = vmatmul.mubr.f32.gmra.mrb[28].mxu1 %v872_v55 }
 0x225   : > { %v1593_v31 = vpop.f32.mrb[14].mxu1 }
 0x226   : > { %v856_v56 = vadd.f32 %v1593_v31, %v2379_v57  ;;  %v850_v58 = vpop.f32.mrb[15].mxu1 }
 0x227   : > { %v851_v59 = vadd.f32 %v2379_v57, %v850_v58 }
 0x228   : > { %v874_v61 = vmax.f32 %v856_v56, 0.0 }
 0x229   : > { %v873_v60 = vmax.f32 %v851_v59, 0.0 }
 0x22b   : > { %1647 = vmatprep.mubr.f32.mxu1 %v873_v60 }
 0x22c   : > { %1648 = vmatmul.mubr.f32.gmra.mrb[30].mxu1 %v874_v61 }
 0x2a2   : > { %v1248_v52 = vpop.permute.xlu0 %1247 }
 0x2c7   : > { %v1628_v57 = vpop.f32.mrb[16].mxu1 }
 0x2c8   : > { %v970_v2 = vadd.f32 %v1628_v57, %v1419_v1  ;;  %v964_v3 = vpop.f32.mrb[17].mxu1 }
 0x2c9   : > { %v965_v5 = vadd.f32 %v1419_v1, %v964_v3 }
 0x2ca   : > { %v1044_v7 = vmax.f32 %v970_v2, 0.0 }
 0x2cb   : > { %v1043_v6 = vmax.f32 %v965_v5, 0.0 }
 0x2cd   : > { %1682 = vmatprep.mubr.f32.mxu1 %v1043_v6 }
 0x2ce   : > { %1683 = vmatmul.mubr.f32.vlgmr.msra.gmra.mrb[32].mxu1 %v1044_v7 }
 0x2cf   : > { %v1631_v8 = vpop.f32.mrb[18].mxu1 }
 0x2d0   : > { %v980_v9 = vadd.f32 %v1631_v8, %v1419_v1  ;;  %v974_v10 = vpop.f32.mrb[19].mxu1 }
 0x2d1   : > { %v975_v11 = vadd.f32 %v1419_v1, %v974_v10 }
 0x2d2   : > { %v1046_v13 = vmax.f32 %v980_v9, 0.0 }
 0x2d3   : > { %v1045_v12 = vmax.f32 %v975_v11, 0.0 }
 0x2d5   : > { %1685 = vmatprep.mubr.f32.mxu1 %v1045_v12 }
 0x2d6   : > { %1686 = vmatmul.mubr.f32.gmra.mrb[34].mxu1 %v1046_v13 }
 0x2d7   : > { %v1634_v14 = vpop.f32.mrb[20].mxu1 }
 0x2d8   : > { %v990_v15 = vadd.f32 %v1634_v14, %v1419_v1  ;;  %v984_v16 = vpop.f32.mrb[21].mxu1 }
 0x2d9   : > { %v985_v17 = vadd.f32 %v1419_v1, %v984_v16 }
 0x2da   : > { %v1048_v19 = vmax.f32 %v990_v15, 0.0 }
 0x2db   : > { %v1047_v18 = vmax.f32 %v985_v17, 0.0 }
 0x2dd   : > { %1688 = vmatprep.mubr.f32.mxu1 %v1047_v18 }
 0x2de   : > { %1689 = vmatmul.mubr.f32.gmra.mrb[36].mxu1 %v1048_v19 }
 0x2df   : > { %v1637_v20 = vpop.f32.mrb[22].mxu1 }
 0x2e0   : > { %v1000_v21 = vadd.f32 %v1637_v20, %v1419_v1  ;;  %v994_v22 = vpop.f32.mrb[23].mxu1 }
 0x2e1   : > { %v995_v23 = vadd.f32 %v1419_v1, %v994_v22 }
 0x2e2   : > { %v1050_v25 = vmax.f32 %v1000_v21, 0.0 }
 0x2e3   : > { %v1049_v24 = vmax.f32 %v995_v23, 0.0 }
 0x2e5   : > { %1691 = vmatprep.mubr.f32.mxu1 %v1049_v24 }
 0x2e6   : > { %1692 = vmatmul.mubr.f32.gmra.mrb[38].mxu1 %v1050_v25 }
 0x2e7   : > { %v1640_v26 = vpop.f32.mrb[24].mxu1 }
 0x2e8   : > { %v1010_v27 = vadd.f32 %v1640_v26, %v1419_v1  ;;  %v1004_v28 = vpop.f32.mrb[25].mxu1 }
 0x2e9   : > { %v1005_v29 = vadd.f32 %v1419_v1, %v1004_v28 }
 0x2ea   : > { %v1052_v32 = vmax.f32 %v1010_v27, 0.0 }
 0x2eb   : > { %v1051_v30 = vmax.f32 %v1005_v29, 0.0 }
 0x2ed   : > { %1694 = vmatprep.mubr.f32.mxu1 %v1051_v30 }
 0x2ee   : > { %1695 = vmatmul.mubr.f32.gmra.mrb[40].mxu1 %v1052_v32 }
 0x2ef   : > { %v1643_v33 = vpop.f32.mrb[26].mxu1 }
 0x2f0   : > { %v1020_v34 = vadd.f32 %v1643_v33, %v1419_v1  ;;  %v1014_v35 = vpop.f32.mrb[27].mxu1 }
 0x2f1   : > { %v1015_v36 = vadd.f32 %v1419_v1, %v1014_v35 }
 0x2f2   : > { %v1054_v38 = vmax.f32 %v1020_v34, 0.0 }
 0x2f3   : > { %v1053_v37 = vmax.f32 %v1015_v36, 0.0 }
 0x2f5   : > { %1697 = vmatprep.mubr.f32.mxu1 %v1053_v37 }
 0x2f6   : > { %1698 = vmatmul.mubr.f32.gmra.mrb[42].mxu1 %v1054_v38 }
 0x2f7   : > { %v1646_v39 = vpop.f32.mrb[28].mxu1 }
 0x2f8   : > { %v1030_v40 = vadd.f32 %v1646_v39, %v1419_v1  ;;  %v1024_v41 = vpop.f32.mrb[29].mxu1 }
 0x2f9   : > { %v1025_v42 = vadd.f32 %v1419_v1, %v1024_v41 }
 0x2fa   : > { %v1056_v44 = vmax.f32 %v1030_v40, 0.0 }
 0x2fb   : > { %v1055_v43 = vmax.f32 %v1025_v42, 0.0 }
 0x2fd   : > { %1700 = vmatprep.mubr.f32.mxu1 %v1055_v43 }
 0x2fe   : > { %1701 = vmatmul.mubr.f32.gmra.mrb[44].mxu1 %v1056_v44 }
 0x2ff   : > { %v1649_v45 = vpop.f32.mrb[30].mxu1 }
 0x300   : > { %v1040_v46 = vadd.f32 %v1649_v45, %v1419_v1  ;;  %v1034_v47 = vpop.f32.mrb[31].mxu1 }
 0x301   : > { %v1035_v48 = vadd.f32 %v1419_v1, %v1034_v47 }
 0x302   : > { %v1058_v50 = vmax.f32 %v1040_v46, 0.0 }
 0x303   : > { %v1057_v49 = vmax.f32 %v1035_v48, 0.0  ;;  %v1243_v48 = vld [vmem:[%s2529_s9] sm:$0x1] }
 0x305   : > { %1703 = vmatprep.mubr.f32.mxu1 %v1057_v49  ;;  %v1250_v49 = vlaneseq }
 0x306   : > { %1704 = vmatmul.mubr.f32.gmra.mrb[46].mxu1 %v1058_v50 }
 0x307   : > { %v1251_v50 = vshrl.u32 %v1250_v49, 7 }
 0x309   : > { %v1252_v51 = vsub.s32 0, %v1251_v50 }
 0x30b   : > { %v1253_v53 = vrot.slane %v1248_v52, %v1252_v51 }
 0x3a1   : > { %v1684_v55 = vpop.f32.mrb[32].mxu1 }
 0x3a2   : > { %v1154_v31 = vadd.f32 %v1684_v55, %v2445_v54  ;;  %v1148_v56 = vpop.f32.mrb[33].mxu1 }
 0x3a3   : > { %v1149_v58 = vadd.f32 %v2445_v54, %v1148_v56 }
 0x3a4   : > { %v1228_v59 = vmax.f32 %v1154_v31, 0.0 }
 0x3a5   : > { %v1227_v60 = vmax.f32 %v1149_v58, 0.0 }
 0x3a7   : > { %v1872_v61 = vpack.c.bf16 %v1228_v59, %v1227_v60 }
 0x3a9   : > { %v1687_v62 = vpop.f32.mrb[34].mxu1  ;;  %1873 = vmatpush3.bf16.xpose.msra.mxu0 %v1872_v61 }
 0x3aa   : > { %v1164_v63 = vadd.f32 %v1687_v62, %v2445_v54  ;;  %v1158_v0 = vpop.f32.mrb[35].mxu1  ;;  %1874 = vmatprep.subr.bf16.mxu0 %v2004_v4 }
 0x3ab   : > { %v1159_v1 = vadd.f32 %v2445_v54, %v1158_v0 }
 0x3ac   : > { %v1230_v57 = vmax.f32 %v1164_v63, 0.0 }
 0x3ad   : > { %v1229_v2 = vmax.f32 %v1159_v1, 0.0 }
 0x3af   : > { %v1875_v3 = vpack.c.bf16 %v1230_v57, %v1229_v2 }
 0x3b1   : > { %v1690_v5 = vpop.f32.mrb[36].mxu1  ;;  %1876 = vmatpush3.bf16.xpose.msra.mxu0 %v1875_v3 }
 0x3b2   : > { %v1174_v6 = vadd.f32 %v1690_v5, %v2445_v54  ;;  %v1168_v7 = vpop.f32.mrb[37].mxu1  ;;  %1877 = vmatprep.subr.bf16.mxu0 %v2004_v4 }
 0x3b3   : > { %v1169_v8 = vadd.f32 %v2445_v54, %v1168_v7 }
 0x3b4   : > { %v1232_v9 = vmax.f32 %v1174_v6, 0.0 }
 0x3b5   : > { %v1231_v10 = vmax.f32 %v1169_v8, 0.0 }
 0x3b7   : > { %v1878_v11 = vpack.c.bf16 %v1232_v9, %v1231_v10 }
 0x3b9   : > { %v1693_v12 = vpop.f32.mrb[38].mxu1  ;;  %1879 = vmatpush3.bf16.xpose.msra.mxu0 %v1878_v11 }
 0x3ba   : > { %v1184_v13 = vadd.f32 %v1693_v12, %v2445_v54  ;;  %v1178_v14 = vpop.f32.mrb[39].mxu1  ;;  %1880 = vmatprep.subr.bf16.mxu0 %v2004_v4 }
 0x3bb   : > { %v1179_v15 = vadd.f32 %v2445_v54, %v1178_v14 }
 0x3bc   : > { %v1234_v16 = vmax.f32 %v1184_v13, 0.0 }
 0x3bd   : > { %v1233_v17 = vmax.f32 %v1179_v15, 0.0 }
 0x3bf   : > { %v1881_v18 = vpack.c.bf16 %v1234_v16, %v1233_v17 }
 0x3c1   : > { %v1696_v19 = vpop.f32.mrb[40].mxu1  ;;  %1882 = vmatpush3.bf16.xpose.msra.mxu0 %v1881_v18 }
 0x3c2   : > { %v1194_v20 = vadd.f32 %v1696_v19, %v2445_v54  ;;  %v1188_v21 = vpop.f32.mrb[41].mxu1  ;;  %1883 = vmatprep.subr.bf16.mxu0 %v2004_v4 }
 0x3c3   : > { %v1189_v22 = vadd.f32 %v2445_v54, %v1188_v21 }
 0x3c4   : > { %v1236_v23 = vmax.f32 %v1194_v20, 0.0 }
 0x3c5   : > { %v1235_v24 = vmax.f32 %v1189_v22, 0.0 }
 0x3c7   : > { %v1884_v25 = vpack.c.bf16 %v1236_v23, %v1235_v24 }
 0x3c9   : > { %v1699_v26 = vpop.f32.mrb[42].mxu1  ;;  %1885 = vmatpush3.bf16.xpose.msra.mxu0 %v1884_v25 }
 0x3ca   : > { %v1204_v27 = vadd.f32 %v1699_v26, %v2445_v54  ;;  %v1198_v28 = vpop.f32.mrb[43].mxu1  ;;  %1886 = vmatprep.subr.bf16.mxu0 %v2004_v4 }
 0x3cb   : > { %v1199_v29 = vadd.f32 %v2445_v54, %v1198_v28 }
 0x3cc   : > { %v1238_v30 = vmax.f32 %v1204_v27, 0.0 }
 0x3cd   : > { %v1237_v32 = vmax.f32 %v1199_v29, 0.0 }
 0x3cf   : > { %v1887_v33 = vpack.c.bf16 %v1238_v30, %v1237_v32 }
 0x3d1   : > { %v1702_v34 = vpop.f32.mrb[44].mxu1  ;;  %1888 = vmatpush3.bf16.xpose.msra.mxu0 %v1887_v33 }
 0x3d2   : > { %v1214_v35 = vadd.f32 %v1702_v34, %v2445_v54  ;;  %v1208_v36 = vpop.f32.mrb[45].mxu1  ;;  %1889 = vmatprep.subr.bf16.mxu0 %v2004_v4 }
 0x3d3   : > { %v1209_v37 = vadd.f32 %v2445_v54, %v1208_v36 }
 0x3d4   : > { %v1240_v38 = vmax.f32 %v1214_v35, 0.0 }
 0x3d5   : > { %v1239_v39 = vmax.f32 %v1209_v37, 0.0 }
 0x3d7   : > { %v1890_v40 = vpack.c.bf16 %v1240_v38, %v1239_v39 }
 0x3d9   : > { %v1705_v41 = vpop.f32.mrb[46].mxu1  ;;  %1891 = vmatpush3.bf16.xpose.msra.mxu0 %v1890_v40 }
 0x3da   : > { %v1224_v42 = vadd.f32 %v1705_v41, %v2445_v54  ;;  %v1218_v43 = vpop.f32.mrb[47].mxu1  ;;  %1892 = vmatprep.subr.bf16.mxu0 %v2004_v4 }
 0x3db   : > { %v1219_v44 = vadd.f32 %v2445_v54, %v1218_v43 }
 0x3dc   : > { %v1242_v45 = vmax.f32 %v1224_v42, 0.0 }
 0x3dd   : > { %v1241_v46 = vmax.f32 %v1219_v44, 0.0 }
 0x3df   : > { %v1893_v47 = vpack.c.bf16 %v1242_v45, %v1241_v46 }
 0x3e1   : > { %1894 = vmatpush3.bf16.xpose.msra.mxu0 %v1893_v47 }
 0x3e8   : > { %1739 = vmatmul.mubr.f32.vlgmr.msra.gmra.mrb[32].mxu0 %v1243_v48 }
 0x4bb   : > { %v1320_v4 = vpop.f32.mrb[32].mxu0 }
 0x4bc   : > { %v1321_v54 = vadd.f32 %v1320_v4, %v1253_v53  ;;  %v1740_v55 = vpop.f32.mrb[33].mxu0 }
 0x4be   : > { %1324 = vst [vmem:[%s398_s25] sm:$0x1] %v1321_v54 }
 0x4bf   : > { %1953 = shalt.err (!%p1950_p3)
}
 0x4c0   : > { %s1954_s23 = scalar_lea.hbm %s2478_s12, 16  ;;  %s1958_s16 = scalar_lea.hbm %s2531_s11, 48 }
 0x4c1   : > { %p1955_p4 = scmp.ne.s32.totalorder %s2478_s12, %s1954_s23  ;;  %p1959_p9 = scmp.lt.u32.totalorder %s2478_s12, %s2531_s11 }
 0x4c2   : > { %p1960_p10 = scmp.lt.u32.totalorder %s1958_s16, %s1954_s23  ;;  %p1962_p12 = scmp.lt.u32.totalorder %s1954_s23, %s2478_s12 }
 0x4c3   : > { %p1956_p7 = pnand %p1955_p4, %p2108_p5 }
 0x4c4   : > { %p1961_p11 = por %p1960_p10, %p1959_p9 }
 0x4c5   : > { %p1957_p8 = pneg %p1956_p7 }
 0x4c6   : > { %p1963_p13 = por %p1962_p12, %p1961_p11 }
 0x4c8   : > { %p1964_p0 = pnand %p1963_p13, %p1957_p8 }
 0x4ca   : > { %1967 = shalt.err (!%p1964_p0)
}
 0x4cb   : > { %1895 = dma.vmem_to_hbm [thread:$0]  (%p2108_p5), %s2480_s26, 16, %s2478_s12, %s1326_s13  }
 0x4cc PF: > { %p1901_p1 = scmp.ge.s32.totalorder %s2002_s22, 2  ;;  %s1350_s14 = sand.u32 1, %s1990_s19  }
 0x4cd   : > { %s1351_s15 = scalar_lea.sflag [#allocation4], %s1350_s14 }
 0x4ce   : > { %p1898_p2 = pnand %p1901_p1, %p2112_p6 }
 0x4d0   : > { %1985 = dma.done.wait (!%p1898_p2), %s1351_s15, 16  }
 0x4d1   : > { %1987 = vsyncadd (!%p1898_p2), %s1351_s15, 4294967280  ;;  %p23_p3 = scmp.ge.s32.totalorder %s2096_s24, 5   ;;  %s2534_s19 = smov %s1994_s20 }
 0x4d2   : > { %s2535_s20 = smov %s1998_s21  ;;  %s2536_s21 = smov %s2106_s27 }
 0x4d3   : > { %s2537_s22 = smov %s2096_s24  ;;  %25 = sbr.rel (!%p23_p3) target bundleno = 6 (0x6), region = 99 }
 0x4da   :  { %1355 = vsyncpa [#allocation4], 1 }
 0x4db   :  { %1357 = vsyncpa [#allocation4 + $0x1], 1 }

</bundles_post_ra>
